<compile_context>
chip_gen: v6e
topology: v6e:2x2x1
jax: 0.10.0
libtpu: 0.0.40
codegen_flags: <defaults>
</compile_context>

<pallas_src>
import jax
import jax.numpy as jnp
from jax.experimental import pallas as pl
from jax.experimental.pallas import tpu as pltpu


# --------------------------------------------------------------------------- #
# Kernel bodies
# --------------------------------------------------------------------------- #
def _prewitt_block(x, h_axis, w_axis):
    """Separable Prewitt magnitude over the H/W axes of a loaded block.

    Gx = [[-1,0,1]]*3 / 3  -> (right column-sum) - (left column-sum)
    Gy = [[1,1,1],[0,0,0],[-1,-1,-1]] / 3 -> (top row-sum) - (bottom row-sum)
    sqrt((gx/3)^2 + (gy/3)^2) == sqrt(gx^2 + gy^2) * (1/3): one multiply.
    """
    H, W = x.shape[h_axis], x.shape[w_axis]
    sh = lambda a, s, e: jax.lax.slice_in_dim(a, s, e, axis=h_axis)
    sw = lambda a, s, e: jax.lax.slice_in_dim(a, s, e, axis=w_axis)

    colsum = sh(x, 0, H - 2) + sh(x, 1, H - 1) + sh(x, 2, H)      # vertical 3-sum
    rowsum = sw(x, 0, W - 2) + sw(x, 1, W - 1) + sw(x, 2, W)      # horizontal 3-sum

    gx = (sw(colsum, 2, W) - sw(colsum, 0, W - 2)).astype(jnp.float32)
    gy = (sh(rowsum, 0, H - 2) - sh(rowsum, 2, H)).astype(jnp.float32)
    return jnp.sqrt(gx * gx + gy * gy) * (1.0 / 3.0)


def _prewitt_kernel_nhw(x_ref, o_ref):
    """(TB, H, W) input block -> (TB, H-2, W-2) gradient magnitude."""
    xin = x_ref[...]
    # bf16 stays bf16 for the stencil adds (v6e/v7x bf16 VALU); everything else f32.
    acc_dt = jnp.bfloat16 if xin.dtype == jnp.bfloat16 else jnp.float32
    o_ref[...] = _prewitt_block(xin.astype(acc_dt), h_axis=1, w_axis=2).astype(o_ref.dtype)


def _prewitt_kernel_hwn(x_ref, o_ref):
    """(H, W, TN) lane-dense block (batch on lanes) -> (H-2, W-2, TN).

    H-shifts are leading-dim address offsets (free); W-shifts are sublane-only;
    the lane axis (batch) is never shifted -> minimal XLU pressure.
    """
    xin = x_ref[...]
    acc_dt = jnp.bfloat16 if xin.dtype == jnp.bfloat16 else jnp.float32
    o_ref[...] = _prewitt_block(xin.astype(acc_dt), h_axis=0, w_axis=1).astype(o_ref.dtype)


# --------------------------------------------------------------------------- #
# Tiling / VMEM budgeting helpers
# --------------------------------------------------------------------------- #
def _ceil_to(x: int, m: int) -> int:
    return ((x + m - 1) // m) * m


def _padded_vmem_bytes(shape, dtype) -> int:
    """VMEM-resident bytes of one block: second-to-last dim padded to the
    sublane tile, last dim padded to 128 lanes (leading dims unpadded)."""
    itemsize = jnp.dtype(dtype).itemsize
    sublane_tile = max(8, 32 // itemsize)        # 8 for f32, 16 for bf16, 32 for int8
    lead = 1
    for d in shape[:-2]:
        lead *= d
    sub = _ceil_to(shape[-2], sublane_tile)
    lane = _ceil_to(shape[-1], 128)
    return lead * sub * lane * itemsize


def _vmem_capacity_bytes() -> int:
    """Physical per-core VMEM; conservative v7x fallback if the query fails."""
    try:
        info = pltpu.get_tpu_info()
        cap = getattr(info, "vmem_capacity_bytes", None)
        if cap:
            return int(cap)
    except Exception:
        pass
    return 64 * 1024 * 1024


def _pick_batch_tile(n: int, footprint, budget: int) -> int:
    """Largest batch tile whose full resident footprint fits `budget` while
    keeping >= min(4, n) grid steps for DMA/compute overlap."""
    target_steps = min(4, n)
    best = 1
    for tb in range(2, n + 1):
        if footprint(tb) > budget or pl.cdiv(n, tb) < target_steps:
            break
        best = tb
    return best


def _pick_lane_tile(n: int, footprint, budget: int) -> int:
    """Lane tile (multiple of 128) for the batch-on-lanes layout; keeps >= 2
    grid steps (>= 4 when n is large enough) and respects the VMEM budget."""
    target_steps = min(4, pl.cdiv(n, 128))
    best = 128
    for tn in range(256, _ceil_to(n, 128) + 1, 128):
        if footprint(tn) > budget or pl.cdiv(n, tn) < target_steps:
            break
        best = tn
    return best


# --------------------------------------------------------------------------- #
# Public wrapper
# --------------------------------------------------------------------------- #
def prewitt(img: jax.Array, out_dtype=jnp.float32) -> jax.Array:
    """img: (N, 1, H, W) -> (N, 1, H-2, W-2) Prewitt gradient magnitude."""
    N, C, H, W = img.shape
    assert C == 1, "Prewitt module expects a single input channel"
    assert H >= 3 and W >= 3, "spatial dims must be at least 3"
    Hout, Wout = H - 2, W - 2

    x = img[:, 0, :, :]                                   # (N, H, W), dtype preserved
    vmem_cap = (3 * _vmem_capacity_bytes()) // 4          # leave compiler headroom
    block_budget = min(4 * 1024 * 1024, vmem_cap)         # ~1-4 MiB resident per step

    # Lane-dense layout only when batch-on-lanes is denser than W-on-lanes.
    use_hwn = (W < 128) and (N >= 128)

    if use_hwn:
        operand = jnp.transpose(x, (1, 2, 0))             # (H, W, N): batch on lanes

        def footprint(tn):
            fin = _padded_vmem_bytes((H, W, tn), x.dtype)
            fout = _padded_vmem_bytes((Hout, Wout, tn), out_dtype)
            ftmp = 5 * _padded_vmem_bytes((H, W, tn), jnp.float32)
            return 2 * fin + 2 * fout + ftmp              # double-buffered in+out

        tn = _pick_lane_tile(N, footprint, block_budget)
        fp = footprint(tn)
        grid = (pl.cdiv(N, tn),)
        in_specs = [pl.BlockSpec((H, W, tn), lambda i: (0, 0, i))]
        out_specs = pl.BlockSpec((Hout, Wout, tn), lambda i: (0, 0, i))
        out_shape = jax.ShapeDtypeStruct((Hout, Wout, N), out_dtype)
        kernel = _prewitt_kernel_hwn
    else:
        operand = x

        def footprint(tb):
            fin = _padded_vmem_bytes((tb, H, W), x.dtype)
            fout = _padded_vmem_bytes((tb, Hout, Wout), out_dtype)
            ftmp = 5 * _padded_vmem_bytes((tb, H, W), jnp.float32)
            return 2 * fin + 2 * fout + ftmp

        tb = _pick_batch_tile(N, footprint, block_budget)
        fp = footprint(tb)
        grid = (pl.cdiv(N, tb),)                          # ragged tail block is masked
        in_specs = [pl.BlockSpec((tb, H, W), lambda i: (i, 0, 0))]
        out_specs = pl.BlockSpec((tb, Hout, Wout), lambda i: (i, 0, 0))
        out_shape = jax.ShapeDtypeStruct((N, Hout, Wout), out_dtype)
        kernel = _prewitt_kernel_nhw

    vmem_limit = int(min(max(32 * 1024 * 1024, 2 * fp), vmem_cap))

    out = pl.pallas_call(
        kernel,
        out_shape=out_shape,
        grid_spec=pltpu.PrefetchScalarGridSpec(
            num_scalar_prefetch=0,
            grid=grid,
            in_specs=in_specs,
            out_specs=out_specs,
        ),
        compiler_params=pltpu.CompilerParams(
            dimension_semantics=("parallel",),
            vmem_limit_bytes=vmem_limit,
        ),
    )(operand)

    if use_hwn:
        out = jnp.transpose(out, (2, 0, 1))               # back to (N, Hout, Wout)
    return out[:, None, :, :]                             # (N, 1, Hout, Wout)


# --------------------------------------------------------------------------- #
# Plain-JAX reference (mirrors the PyTorch module) for verification
# --------------------------------------------------------------------------- #
def _reference(img: jax.Array) -> jax.Array:
    Gx = jnp.array([[-1.0, 0.0, 1.0],
                    [-1.0, 0.0, 1.0],
                    [-1.0, 0.0, 1.0]], dtype=jnp.float32) / 3.0
    Gy = jnp.array([[1.0, 1.0, 1.0],
                    [0.0, 0.0, 0.0],
                    [-1.0, -1.0, -1.0]], dtype=jnp.float32) / 3.0
    Wt = jnp.stack([Gx, Gy], axis=0)[:, None, :, :]       # (2,1,3,3) OIHW
    y = jax.lax.conv_general_dilated(
        img.astype(jnp.float32), Wt, window_strides=(1, 1), padding="VALID",
        dimension_numbers=("NCHW", "OIHW", "NCHW"))
    y = jnp.sum(y * y, axis=1, keepdims=True)
    return jnp.sqrt(y)


if __name__ == "__main__":
    key = jax.random.PRNGKey(0)
    k1, k2, k3, k4 = jax.random.split(key, 4)

    # Case 1: small batch, f32 -> (N,H,W) layout, tb=1, 4-step parallel grid.
    img1 = jax.random.normal(k1, (4, 1, 16, 16), dtype=jnp.float32)
    out1 = prewitt(img1)
    jax.block_until_ready(out1)
    assert out1.shape == (4, 1, 14, 14), out1.shape
    assert jnp.allclose(out1, _reference(img1), atol=1e-5, rtol=1e-5), "mismatch (case 1)"

    # Case 2: non-square spatial dims.
    img2 = jax.random.normal(k2, (2, 1, 20, 24), dtype=jnp.float32)
    out2 = prewitt(img2)
    jax.block_until_ready(out2)
    assert out2.shape == (2, 1, 18, 22), out2.shape
    assert jnp.allclose(out2, _reference(img2), atol=1e-5, rtol=1e-5), "mismatch (case 2)"

    # Case 3: N=9 -> tb=2, grid=cdiv(9,2)=5 with a masked ragged tail block.
    img3 = jax.random.normal(k3, (9, 1, 16, 16), dtype=jnp.float32)
    out3 = prewitt(img3)
    jax.block_until_ready(out3)
    assert out3.shape == (9, 1, 14, 14), out3.shape
    assert jnp.allclose(out3, _reference(img3), atol=1e-5, rtol=1e-5), "mismatch (case 3)"

    # Case 4: large batch, tiny W -> lane-dense (H, W, N) layout, tn=128, grid 2.
    img4 = jax.random.normal(k4, (256, 1, 10, 16), dtype=jnp.float32)
    out4 = prewitt(img4)
    jax.block_until_ready(out4)
    assert out4.shape == (256, 1, 8, 14), out4.shape
    assert jnp.allclose(out4, _reference(img4), atol=1e-5, rtol=1e-5), "mismatch (case 4)"

    # Case 5: bf16 input path (stencil adds in bf16, f32 magnitude/output).
    img5 = img1.astype(jnp.bfloat16)
    out5 = prewitt(img5)
    jax.block_until_ready(out5)
    assert out5.shape == (4, 1, 14, 14), out5.shape
    assert jnp.allclose(out5, _reference(img5), atol=1.5e-1, rtol=5e-2), "mismatch (case 5)"

    print("KERNEL_OK")
</pallas_src>

<mosaic_0001>
module attributes {stable_mosaic.version = 11 : i64} {
  func.func @_prewitt_kernel_nhw(%arg0: i32, %arg1: memref<1x16x16xf32, #tpu.memory_space<vmem>>, %arg2: memref<1x14x14xf32, #tpu.memory_space<vmem>>) attributes {dimension_semantics = [#tpu.dimension_semantics<parallel>], iteration_bounds = array<i64: 4>, scalar_prefetch = 0 : i64, scratch_operands = 0 : i64, tpu.core_type = #tpu.core_type<tc>, window_params = [{transform_indices = @transform_0, window_bounds = array<i64: 1, 16, 16>}, {transform_indices = @transform_1, window_bounds = array<i64: 1, 14, 14>}]} {
    %c0 = arith.constant 0 : index
    %c0_0 = arith.constant 0 : index
    %c0_1 = arith.constant 0 : index
    %0 = vector.load %arg1[%c0, %c0_0, %c0_1] : memref<1x16x16xf32, #tpu.memory_space<vmem>>, vector<1x16x16xf32>
    %1 = vector.extract_strided_slice %0 {offsets = [0, 0, 0], sizes = [1, 14, 16], strides = [1, 1, 1]} : vector<1x16x16xf32> to vector<1x14x16xf32>
    %2 = vector.extract_strided_slice %0 {offsets = [0, 1, 0], sizes = [1, 14, 16], strides = [1, 1, 1]} : vector<1x16x16xf32> to vector<1x14x16xf32>
    %3 = arith.addf %1, %2 : vector<1x14x16xf32>
    %4 = vector.extract_strided_slice %0 {offsets = [0, 2, 0], sizes = [1, 14, 16], strides = [1, 1, 1]} : vector<1x16x16xf32> to vector<1x14x16xf32>
    %5 = arith.addf %3, %4 : vector<1x14x16xf32>
    %6 = vector.extract_strided_slice %0 {offsets = [0, 0, 0], sizes = [1, 16, 14], strides = [1, 1, 1]} : vector<1x16x16xf32> to vector<1x16x14xf32>
    %7 = vector.extract_strided_slice %0 {offsets = [0, 0, 1], sizes = [1, 16, 14], strides = [1, 1, 1]} : vector<1x16x16xf32> to vector<1x16x14xf32>
    %8 = arith.addf %6, %7 : vector<1x16x14xf32>
    %9 = vector.extract_strided_slice %0 {offsets = [0, 0, 2], sizes = [1, 16, 14], strides = [1, 1, 1]} : vector<1x16x16xf32> to vector<1x16x14xf32>
    %10 = arith.addf %8, %9 : vector<1x16x14xf32>
    %11 = vector.extract_strided_slice %5 {offsets = [0, 0, 2], sizes = [1, 14, 14], strides = [1, 1, 1]} : vector<1x14x16xf32> to vector<1x14x14xf32>
    %12 = vector.extract_strided_slice %5 {offsets = [0, 0, 0], sizes = [1, 14, 14], strides = [1, 1, 1]} : vector<1x14x16xf32> to vector<1x14x14xf32>
    %13 = arith.subf %11, %12 : vector<1x14x14xf32>
    %14 = vector.extract_strided_slice %10 {offsets = [0, 0, 0], sizes = [1, 14, 14], strides = [1, 1, 1]} : vector<1x16x14xf32> to vector<1x14x14xf32>
    %15 = vector.extract_strided_slice %10 {offsets = [0, 2, 0], sizes = [1, 14, 14], strides = [1, 1, 1]} : vector<1x16x14xf32> to vector<1x14x14xf32>
    %16 = arith.subf %14, %15 : vector<1x14x14xf32>
    %17 = arith.mulf %13, %13 : vector<1x14x14xf32>
    %18 = arith.mulf %16, %16 : vector<1x14x14xf32>
    %19 = arith.addf %17, %18 : vector<1x14x14xf32>
    %20 = math.sqrt %19 : vector<1x14x14xf32>
    %cst = arith.constant 0.333333343 : f32
    %21 = vector.broadcast %cst : f32 to vector<1x14x14xf32>
    %22 = arith.mulf %20, %21 : vector<1x14x14xf32>
    %c0_2 = arith.constant 0 : index
    %c0_3 = arith.constant 0 : index
    %c0_4 = arith.constant 0 : index
    %23 = vector.load %arg2[%c0_2, %c0_3, %c0_4] : memref<1x14x14xf32, #tpu.memory_space<vmem>>, vector<1x14x14xf32>
    tpu.vector_store %arg2[%c0_2, %c0_3, %c0_4], %22 {strides = array<i32>} : memref<1x14x14xf32, #tpu.memory_space<vmem>>, vector<1x14x14xf32>,
    return
  }
  func.func @transform_0(%arg0: i32) -> (i32, i32, i32) {
    %c0_i32 = arith.constant 0 : i32
    %c0_i32_0 = arith.constant 0 : i32
    %c0_i32_1 = arith.constant 0 : i32
    return %arg0, %c0_i32, %c0_i32_0 : i32, i32, i32
  }
  func.func @transform_1(%arg0: i32) -> (i32, i32, i32) {
    %c0_i32 = arith.constant 0 : i32
    %c0_i32_0 = arith.constant 0 : i32
    %c0_i32_1 = arith.constant 0 : i32
    return %arg0, %c0_i32, %c0_i32_0 : i32, i32, i32
  }
}

</mosaic_0001>

<bundles_post_ra>
// kernel: tpu_custom_call.1
= control target key start
LH: loop header
LB: loop body
LE: loop exit
PB: predicated region body
PF: predicated region fallthrough
CT: control target
= control target key end

     0   :  { %6 = vsyncpa [#allocation3], 0  ;;  %s550_s0 = inlined_call_operand.hbm [shape: f32[4,16,16], index: 0, kind: input, shape index: {}]   ;;  %s551_s1 = inlined_call_operand.vmem [shape: f32[4,14,14], index: 1, kind: output, shape index: {}]  }
   0x1   :  { %8 = vsyncpa [#allocation3 + $0x1], 0  ;;  %s443_s6 = smov 0   ;;  %s445_s7 = smov 0  }
   0x2   :  { %s447_s8 = smov 0   ;;  %s449_s9 = smov 0  }
   0x3 LB: > { %s462_s10 = sadd.s32 4294967295, %s425_s9   ;;  %s465_s11 = sadd.s32 1, %s425_s9   ;;  %s425_s9 = sphi %s449_s9, %s560_s9   ;;  %s421_s8 = sphi %s447_s8, %s559_s8   ;;  %s417_s7 = sphi %s445_s7, %s558_s7   ;;  %s413_s6 = sphi %s443_s6, %s557_s6  }
   0x4   : > { %s18_s12 = ssub.s32 %s425_s9, %s465_s11  ;;  %s21_s13 = sadd.s32 1, %s421_s8 }
   0x5   : > { %p19_p0 = scmp.eq.s32.totalorder %s18_s12, 0  ;;  %p28_p1 = scmp.ne.s32.totalorder %s421_s8, %s417_s7 }
   0x6   : > { %p29_p2 = scmp.eq.s32.totalorder %s425_s9, 0  ;;  %p34_p3 = scmp.ne.s32.totalorder %s417_s7, %s413_s6 }
   0x7   : > { %s475_s14 = scalar_select %p19_p0, %s421_s8, %s21_s13  }
   0x8   : > { %p30_p4 = por %p29_p2, %p28_p1  ;;  %p35_p5 = scmp.eq.s32.totalorder %s462_s10, 0 }
   0x9   : > { %p321_p6 = scmp.lt.s32.totalorder %s425_s9, 4  ;;  %s84_s16 = sand.u32 1, %s421_s8  }
   0xa   : > { %p479_p7 = por %p35_p5, %p34_p3  ;;  %s304_s17 = sshll.u32 %s84_s16, 4 }
   0xb   : > { %s313_s18 = sshll.u32 %s425_s9, 8  ;;  %s88_s22 = scalar_lea.vmem [#allocation2], %s304_s17 }
   0xc   : > { %s553_s15 = scalar_select %p479_p7, 1, 0 }
   0xd   : > { %s488_s21 = scalar_lea.hbm %s550_s0, %s313_s18  ;;  %s95_s23 = sshll.u32 %s88_s22, 4  ;;  %s490_s23 = int_to_ptr.vmem [resolvable:$true] %s95_s23 }
   0xe   : > { %p492_p8 = pnand %p321_p6, %p30_p4  ;;  %s497_s25 = scalar_lea.sflag [#allocation3], %s84_s16 }
   0xf   : > { %s363_s26 = scalar_lea.hbm %s488_s21, 256  ;;  %s368_s29 = scalar_lea.hbm %s550_s0, 1024 }
  0x10   : > { %p364_p10 = scmp.ne.s32.totalorder %s488_s21, %s363_s26  ;;  %p365_p11 = pneg %p492_p8 }
  0x11   : > { %p369_p0 = scmp.lt.s32.totalorder %s488_s21, %s550_s0  ;;  %p370_p1 = scmp.lt.s32.totalorder %s368_s29, %s363_s26 }
  0x12   : > { %p366_p12 = pnand %p365_p11, %p364_p10 }
  0x13   : > { %p371_p2 = por %p370_p1, %p369_p0 }
  0x14   : > { %p367_p13 = pneg %p366_p12 }
  0x16   : > { %p372_p3 = pnand %p371_p2, %p367_p13 }
  0x18   : > { %375 = shalt.err (!%p372_p3)
}
  0x19   : > { %s376_s3 = scalar_lea.vmem %s490_s23, 256  ;;  %s427_s4 = smov [#allocation2]  }
  0x1a   : > { %p377_p4 = scmp.ne.s32.totalorder %s490_s23, %s376_s3  ;;  %s381_s5 = sshll.u32 %s427_s4, 4  ;;  %s382_s5 = int_to_ptr.vmem [resolvable:$false] %s381_s5 }
  0x1b   : > { %s383_s6 = scalar_lea.vmem %s382_s5, 512  ;;  %p384_p10 = scmp.lt.s32.totalorder %s490_s23, %s382_s5 }
  0x1c   : > { %p379_p5 = pnand %p377_p4, %p365_p11  ;;  %p385_p12 = scmp.lt.s32.totalorder %s383_s6, %s376_s3 }
  0x1e   : > { %p380_p6 = pneg %p379_p5  ;;  %p386_p9 = por %p385_p12, %p384_p10 }
  0x20   : > { %p387_p7 = pnand %p386_p9, %p380_p6 }
  0x22   : > { %390 = shalt.err (!%p387_p7)
}
  0x23   : > { %s428_s12 = smov 128   ;;  %s429_s13 = smov 8  }
  0x24   : > { %320 = dma.hbm_to_vmem [thread:$0]  (!%p492_p8), %s488_s21, 256, %s490_s23, %s497_s25, %s428_s12, %s428_s12, %s429_s13  }
  0x25   : > { %p103_p11 = scmp.lt.s32.totalorder %s425_s9, 5  ;;  %p555_p13 = scmp.ge.s32.totalorder %s425_s9, 1 }
  0x27   : > { %p104_p0 = pnand %p555_p13, %p103_p11 }
  0x28   : > { %s109_s16 = sand.u32 (!%p104_p0), 1, %s417_s7   ;;  %p556_p7 = scmp.ne.s32.totalorder (!%p104_p0), %s553_s15, 0 }
  0x29   : > { %107 = sbr.rel (%p104_p0) target bundleno = 431 (0x1af), region = 24  ;;  %s308_s17 = sshll.u32 (!%p104_p0), %s109_s16, 4 }
  0x2a   : > { %s110_s18 = scalar_lea.sflag (!%p104_p0), [#allocation3], %s109_s16  ;;  %s113_s19 = scalar_lea.vmem (!%p104_p0), [#allocation2], %s308_s17 }
  0x2e   : > { %408 = dma.done.wait (%p556_p7), %s110_s18, 256  }
  0x2f   : > { %410 = vsyncadd (%p556_p7), %s110_s18, 4294967040  ;;  %v137_v0 = vld [vmem:[%s113_s19] sm:$0xff]  ;;  %v138_v1 = vld [vmem:[%s113_s19 + $0x8] sm:$0xff]  ;;  %vm141_vm0 = vcmask 1046528   ;;  %vm149_vm1 = vcmask 1045504   ;;  %s430_s20 = smov 127  }
  0x30   : > { %157 = vrot.lane.b32.xlu0 %v137_v0, %s430_s20  ;;  %s431_s9 = smov 126   ;;  %v143_v2 = vrot.slane %v138_v1, 1  ;;  %v151_v3 = vrot.slane %v138_v1, 2  ;;  %v142_v4 = vrot.slane %v137_v0, 1  ;;  %v150_v5 = vrot.slane %v137_v0, 2  ;;  %s432_s15 = smov 2  }
  0x31   : > { %165 = vrot.lane.b32.xlu1 %v137_v0, %s431_s9  ;;  %p132_p8 = scmp.lt.s32.totalorder %s462_s10, 3  ;;  %vm232_vm6 = vcmask 111616   ;;  %vm230_vm7 = vcmask 113664  }
  0x32   : > { %v148_v6 = vadd.f32 %v143_v2, %v138_v1  ;;  %v144_v7 = vsel %vm141_vm0, %v142_v4, %v143_v2  ;;  %v152_v8 = vsel %vm149_vm1, %v150_v5, %v151_v3 }
  0x33   : > { %v147_v9 = vadd.f32 %v144_v7, %v137_v0  ;;  %s562_s10 = smov (!%p132_p8, %s462_s10), 3 }
  0x34   : > { %159 = vrot.lane.b32.xlu0 %v138_v1, %s430_s20  ;;  %v156_v10 = vadd.f32 %v151_v3, %v148_v6  ;;  %s314_s21 = sshll.u32 %s562_s10, 4 }
  0x35   : > { %167 = vrot.lane.b32.xlu1 %v138_v1, %s431_s9  ;;  %v155_v11 = vadd.f32 %v152_v8, %v147_v9  ;;  %s136_s24 = scalar_lea.vmem %s551_s1, %s314_s21 }
  0x38   : > { %175 = vrot.lane.b32.xlu0 %v155_v11, %s432_s15 }
  0x39   : > { %177 = vrot.lane.b32.xlu1 %v156_v10, %s432_s15 }
  0xa2   : > { %v158_v12 = vpop.permute.xlu0 %157 }
  0xa3   : > { %v166_v13 = vpop.permute.xlu1 %165  ;;  %v163_v14 = vadd.f32 %v158_v12, %v137_v0 }
  0xa5   : > { %v171_v17 = vadd.f32 %v166_v13, %v163_v14 }
  0xa6   : > { %v160_v15 = vpop.permute.xlu0 %159 }
  0xa7   : > { %v168_v16 = vpop.permute.xlu1 %167  ;;  %v164_v18 = vadd.f32 %v160_v15, %v138_v1  ;;  %v185_v20 = vrot.slane %v171_v17, 2 }
  0xa9   : > { %v172_v19 = vadd.f32 %v168_v16, %v164_v18 }
  0xaa   : > { %v176_v28 = vpop.permute.xlu0 %175 }
  0xab   : > { %v186_v21 = vrot.slane %v172_v19, 2  ;;  %v178_v27 = vpop.permute.xlu1 %177  ;;  %v181_v30 = vsub.f32 %v155_v11, %v176_v28 }
  0xac   : > { %v182_v29 = vsub.f32 %v156_v10, %v178_v27 }
  0xad   : > { %v191_v22 = vsub.f32 %v172_v19, %v186_v21  ;;  %v187_v23 = vsel %vm149_vm1, %v185_v20, %v186_v21  ;;  %v192_v32 = vmul.f32 %v181_v30, %v181_v30 }
  0xae   : > { %v190_v24 = vsub.f32 %v171_v17, %v187_v23  ;;  %v193_v31 = vmul.f32 %v182_v29, %v182_v29 }
  0xaf   : > { %v195_v25 = vmul.f32 %v191_v22, %v191_v22 }
  0xb0   : > { %v194_v26 = vmul.f32 %v190_v24, %v190_v24 }
  0xb1   : > { %200 = vrot.lane.b32.xlu1 %v195_v25, %s432_s15 }
  0xb2   : > { %198 = vrot.lane.b32.xlu0 %v194_v26, %s432_s15 }
 0x123   : > { %v201_v33 = vpop.permute.xlu1 %200 }
 0x124   : > { %v205_v34 = vadd.f32 %v201_v33, %v193_v31  ;;  %v199_v35 = vpop.permute.xlu0 %198 }
 0x125   : > { %v204_v36 = vadd.f32 %v199_v35, %v192_v32 }
 0x126   : > { %359 = vrsqrt.f32 %v205_v34  ;;  %vm215_vm2 = vcmp.eq.f32.partialorder %v205_v34, inf  ;;  %v218_v40 = vand.u32 2147483648, %v205_v34  ;;  %vm217_vm3 = vcmp.eq.f32.partialorder %v205_v34, 0.0 }
 0x127   : > { %361 = vrsqrt.f32 %v204_v36  ;;  %vm208_vm4 = vcmp.eq.f32.partialorder %v204_v36, inf  ;;  %v211_v43 = vand.u32 2147483648, %v204_v36  ;;  %vm210_vm5 = vcmp.eq.f32.partialorder %v204_v36, 0.0 }
 0x133   : > { %v360_v37 = vpop.eup %359 }
 0x134   : > { %v362_v38 = vpop.eup %361  ;;  %v214_v39 = vmul.f32 %v360_v37, %v205_v34 }
 0x135   : > { %v207_v41 = vmul.f32 %v362_v38, %v204_v36 }
 0x136   : > { %v216_v42 = vsel %vm215_vm2, %v205_v34, %v214_v39 }
 0x137   : > { %v219_v44 = vsel %vm217_vm3, %v218_v40, %v216_v42  ;;  %v209_v45 = vsel %vm208_vm4, %v204_v36, %v207_v41 }
 0x138   : > { %v221_v46 = vmul.f32 0.33333334, %v219_v44  ;;  %v212_v47 = vsel %vm210_vm5, %v211_v43, %v209_v45 }
 0x139   : > { %v220_v48 = vmul.f32 0.33333334, %v212_v47 }
 0x13a   : > { %226 = vrot.lane.b32.xlu1 %v221_v46, %s431_s9 }
 0x13b   : > { %224 = vrot.lane.b32.xlu0 %v220_v48, %s431_s9 }
 0x1ac   : > { %v227_v49 = vpop.permute.xlu1 %226 }
 0x1ad   : > { %233 = vst.msk [vmem:[%s136_s24 + $0x8] sm:$0x3f] %vm232_vm6, %v227_v49  ;;  %v225_v50 = vpop.permute.xlu0 %224 }
 0x1ae   : > { %231 = vst.msk [vmem:[%s136_s24] sm:$0xff] %vm230_vm7, %v225_v50 }
 0x1af PF: > { %p11_p9 = scmp.ge.s32.totalorder %s465_s11, 6   ;;  %s557_s6 = smov %s417_s7 }
 0x1b0   : > { %s558_s7 = smov %s421_s8  ;;  %s559_s8 = smov %s475_s14 }
 0x1b1   : > { %s560_s9 = smov %s465_s11  ;;  %13 = sbr.rel (!%p11_p9) target bundleno = 3 (0x3), region = 64 }
 0x1b6   :  { %255 = vsyncpa [#allocation3], 1 }
 0x1b7   :  { %257 = vsyncpa [#allocation3 + $0x1], 1 }

</bundles_post_ra>
